<compile_context>
chip_gen: v7x
topology: tpu7x:2x2x1
jax: 0.10.0
libtpu: 0.0.40
codegen_flags: <defaults>
</compile_context>

<pallas_src>
import functools

import jax
import jax.numpy as jnp
from jax.experimental import pallas as pl
from jax.experimental.pallas import tpu as pltpu


def _round_up(a: int, b: int) -> int:
    return (a + b - 1) // b * b


def _pick_tile(dim_padded: int, requested: int, base: int = 128) -> int:
    """Largest multiple of `base` that divides dim_padded and is <= requested."""
    requested = max(base, requested - requested % base)
    best = base
    d = base
    while d <= min(dim_padded, requested):
        if dim_padded % d == 0:
            best = d
        d += base
    return best


def _ffn_kernel(x_ref, w1_ref, b1_ref, w2_ref, b2_ref, o_ref, acc_ref):
    # x_ref:  (tm, Cp)  bf16 token tile (DMA'd once per token tile i)
    # w1_ref: (Cp, th)  bf16 W1 hidden-column chunk
    # b1_ref: (1,  th)  f32 bias-1 chunk
    # w2_ref: (th, tn)  bf16 W2 (hidden-row, out-col) chunk
    # b2_ref: (1,  tn)  f32 bias-2 chunk
    # o_ref:  (tm, tn)  output tile (written only on the last hidden chunk)
    # acc_ref:(tm, tn)  f32 VMEM accumulator
    k = pl.program_id(2)

    @pl.when(k == 0)
    def _init():
        # Fold b2 into the accumulator init (drops the finalize add).
        acc_ref[...] = jnp.broadcast_to(b2_ref[...], acc_ref.shape).astype(
            jnp.float32)

    # Matmul 1: bf16 x bf16 -> f32 on the MXU.
    h = jnp.dot(x_ref[...], w1_ref[...], preferred_element_type=jnp.float32)
    # Bias add + ReLU in f32.
    h = jnp.maximum(h + b1_ref[...], 0.0)
    # Matmul 2: cast activations to the weight dtype, accumulate in f32.
    acc_ref[...] += jnp.dot(h.astype(w2_ref.dtype), w2_ref[...],
                            preferred_element_type=jnp.float32)

    @pl.when(k == pl.num_programs(2) - 1)
    def _finalize():
        # Dropout(p=0) is the identity -> nothing else to do.
        o_ref[...] = acc_ref[...].astype(o_ref.dtype)


def prepare_ffn_params(w1, b1, w2, b2, *, compute_dtype=jnp.bfloat16):
    """One-time pad + cast of the weights (hoisted out of the per-call path).

    w1: (C, H), b1: (H,) or (1, H), w2: (H, C), b2: (C,) or (1, C).
    Returns a dict with zero-padded, lane-dense (128-multiple) operands.
    """
    C, H = w1.shape
    f32 = jnp.float32
    Cp = _round_up(max(C, 128), 128)
    Hp = _round_up(max(H, 128), 128)
    w1p = jnp.zeros((Cp, Hp), compute_dtype).at[:C, :H].set(
        w1.astype(compute_dtype))
    b1p = jnp.zeros((1, Hp), f32).at[:, :H].set(b1.astype(f32).reshape(1, H))
    w2p = jnp.zeros((Hp, Cp), compute_dtype).at[:H, :C].set(
        w2.astype(compute_dtype))
    b2p = jnp.zeros((1, Cp), f32).at[:, :C].set(b2.astype(f32).reshape(1, C))
    return dict(w1=w1p, b1=b1p, w2=w2p, b2=b2p,
                C=C, H=H, Cp=Cp, Hp=Hp, compute_dtype=compute_dtype)


@functools.partial(jax.jit,
                   static_argnames=("tm", "th", "tn", "out_dtype",
                                    "vmem_limit_bytes"))
def _ffn_call(xp, w1p, b1p, w2p, b2p, *, tm, th, tn, out_dtype,
              vmem_limit_bytes):
    Mp, Cp = xp.shape
    Hp = w1p.shape[1]
    grid = (Mp // tm, Cp // tn, Hp // th)
    return pl.pallas_call(
        _ffn_kernel,
        out_shape=jax.ShapeDtypeStruct((Mp, Cp), out_dtype),
        grid_spec=pltpu.PrefetchScalarGridSpec(
            num_scalar_prefetch=0,
            grid=grid,
            in_specs=[
                pl.BlockSpec((tm, Cp), lambda i, j, k: (i, 0)),  # x tile
                pl.BlockSpec((Cp, th), lambda i, j, k: (0, k)),  # W1 col chunk
                pl.BlockSpec((1, th),  lambda i, j, k: (0, k)),  # b1 chunk
                pl.BlockSpec((th, tn), lambda i, j, k: (k, j)),  # W2 chunk
                pl.BlockSpec((1, tn),  lambda i, j, k: (0, j)),  # b2 chunk
            ],
            out_specs=pl.BlockSpec((tm, tn), lambda i, j, k: (i, j)),
            scratch_shapes=[pltpu.VMEM((tm, tn), jnp.float32)],
        ),
        compiler_params=pltpu.CompilerParams(
            # Reduction (hidden) axis last; token & out-feature axes parallel
            # so both v7x TensorCores get work even for decode-sized M.
            dimension_semantics=("parallel", "parallel", "arbitrary"),
            vmem_limit_bytes=vmem_limit_bytes,
        ),
    )(xp, w1p, b1p, w2p, b2p)


def feed_forward(x, params, *, tm=512, th=512, tn=512, out_dtype=None,
                 vmem_limit_bytes=48 * 1024 * 1024):
    """x: (B, T, C) -> (B, T, C). Fused Linear->ReLU->Linear in one Pallas call.

    `params` comes from prepare_ffn_params (weights already padded/cast).
    Defaults: tm=512 raises per-weight-byte arithmetic intensity above the
    v6e/v7x HBM rooflines; th/tn=512 keep full 256x256 MXU feeds; 48 MiB VMEM
    cap is v7x-safe (raise to ~100 MiB on v5e/v6e for deeper buffering).
    """
    B, T, C = x.shape
    assert C == params["C"]
    Cp, Hp = params["Cp"], params["Hp"]
    cdt = params["compute_dtype"]
    M = B * T
    out_dtype = x.dtype if out_dtype is None else out_dtype

    # Token tile: multiple of 8 sublanes; don't over-pad tiny inputs.
    tm = max(8, min(_round_up(tm, 8), _round_up(M, 8)))
    Mp = _round_up(M, tm)
    # Hidden chunk / output-feature tile: 128-multiples dividing the padded dims
    # (prefer >=256 on v6e/v7x for full MXU width when the dims allow it).
    th = _pick_tile(Hp, th)
    tn = _pick_tile(Cp, tn)

    # Zero-pad + cast the activations (zero padding keeps the math exact).
    xp = jnp.zeros((Mp, Cp), cdt).at[:M, :C].set(
        x.reshape(M, C).astype(cdt))

    out = _ffn_call(xp, params["w1"], params["b1"], params["w2"], params["b2"],
                    tm=tm, th=th, tn=tn, out_dtype=out_dtype,
                    vmem_limit_bytes=vmem_limit_bytes)
    return out[:M, :C].reshape(B, T, C)


def init_params(key, embed_size):
    """Deterministic init mirroring nn.Linear's U(-1/sqrt(fan_in), 1/sqrt(fan_in))."""
    hidden = 4 * embed_size
    k1, k2, k3, k4 = jax.random.split(key, 4)
    lim1 = 1.0 / (embed_size ** 0.5)
    lim2 = 1.0 / (hidden ** 0.5)
    # Stored as (in, out) so the kernel does x @ W + b.
    w1 = jax.random.uniform(k1, (embed_size, hidden), jnp.float32, -lim1, lim1)
    b1 = jax.random.uniform(k2, (hidden,), jnp.float32, -lim1, lim1)
    w2 = jax.random.uniform(k3, (hidden, embed_size), jnp.float32, -lim2, lim2)
    b2 = jax.random.uniform(k4, (embed_size,), jnp.float32, -lim2, lim2)
    return w1, b1, w2, b2


if __name__ == "__main__":
    embed_size = 64
    B, T = 2, 8

    key = jax.random.PRNGKey(0)
    kx, kp = jax.random.split(key)
    x = jax.random.normal(kx, (B, T, embed_size), jnp.float32)
    w1, b1, w2, b2 = init_params(kp, embed_size)

    # One-time weight pad/cast (hoisted out of the per-call path).
    params = prepare_ffn_params(w1, b1, w2, b2)

    # Reference with matching bf16-multiply / f32-accumulate math.
    def ref_fn(xin):
        xb = xin.reshape(-1, embed_size).astype(jnp.bfloat16)
        h = jnp.dot(xb, w1.astype(jnp.bfloat16),
                    preferred_element_type=jnp.float32) + b1
        h = jnp.maximum(h, 0.0)
        o = jnp.dot(h.astype(jnp.bfloat16), w2.astype(jnp.bfloat16),
                    preferred_element_type=jnp.float32) + b2
        return o.reshape(xin.shape)

    # Small decode-ish shape: single token tile, single N tile, single H chunk.
    y = feed_forward(x, params)
    jax.block_until_ready(y)
    assert y.shape == (B, T, embed_size)
    ref = ref_fn(x)
    assert jnp.allclose(y, ref, atol=2e-3, rtol=2e-3), \
        float(jnp.max(jnp.abs(y - ref)))

    # Larger M with small tiles: exercises the full 3-D grid (4 token tiles x
    # 1 output-feature tile x 2 hidden chunks) and the accumulator init/finalize.
    B2, T2 = 4, 128
    x2 = jax.random.normal(jax.random.PRNGKey(1), (B2, T2, embed_size),
                           jnp.float32)
    y2 = feed_forward(x2, params, tm=128, th=128, tn=128)
    jax.block_until_ready(y2)
    ref2 = ref_fn(x2)
    assert jnp.allclose(y2, ref2, atol=2e-3, rtol=2e-3), \
        float(jnp.max(jnp.abs(y2 - ref2)))

    # bf16 output path (halves writeback DMA + output VMEM).
    y3 = feed_forward(x2, params, tm=128, th=128, tn=128,
                      out_dtype=jnp.bfloat16)
    jax.block_until_ready(y3)
    assert y3.dtype == jnp.bfloat16
    assert jnp.allclose(y3.astype(jnp.float32), ref2, atol=2e-2, rtol=2e-2)

    print("KERNEL_OK")
</pallas_src>

<mosaic_0001>
module attributes {stable_mosaic.version = 11 : i64} {
  func.func @_ffn_kernel(%arg0: i32, %arg1: i32, %arg2: i32, %arg3: memref<16x128xbf16, #tpu.memory_space<vmem>>, %arg4: memref<128x256xbf16, #tpu.memory_space<vmem>>, %arg5: memref<1x256xf32, #tpu.memory_space<vmem>>, %arg6: memref<256x128xbf16, #tpu.memory_space<vmem>>, %arg7: memref<1x128xf32, #tpu.memory_space<vmem>>, %arg8: memref<16x128xf32, #tpu.memory_space<vmem>>, %arg9: memref<16x128xf32, #tpu.memory_space<vmem>>) attributes {dimension_semantics = [#tpu.dimension_semantics<parallel>, #tpu.dimension_semantics<parallel>, #tpu.dimension_semantics<arbitrary>], iteration_bounds = array<i64: 1, 1, 1>, scalar_prefetch = 0 : i64, scratch_operands = 1 : i64, tpu.core_type = #tpu.core_type<tc>, window_params = [{transform_indices = @transform_0, window_bounds = array<i64: 16, 128>}, {transform_indices = @transform_1, window_bounds = array<i64: 128, 256>}, {transform_indices = @transform_2, window_bounds = array<i64: 1, 256>}, {transform_indices = @transform_3, window_bounds = array<i64: 256, 128>}, {transform_indices = @transform_4, window_bounds = array<i64: 1, 128>}, {transform_indices = @transform_5, window_bounds = array<i64: 16, 128>}]} {
    %c0_i32 = arith.constant 0 : i32
    %0 = arith.cmpi eq, %arg2, %c0_i32 : i32
    %1 = arith.extui %0 : i1 to i32
    %c0_i32_0 = arith.constant 0 : i32
    %2 = arith.cmpi ne, %1, %c0_i32_0 : i32
    scf.if %2 {
      %c0_16 = arith.constant 0 : index
      %c0_17 = arith.constant 0 : index
      %20 = vector.load %arg7[%c0_16, %c0_17] : memref<1x128xf32, #tpu.memory_space<vmem>>, vector<1x128xf32>
      %21 = vector.shape_cast %20 : vector<1x128xf32> to vector<1x128xf32>
      %22 = vector.broadcast %21 : vector<1x128xf32> to vector<16x128xf32>
      %c0_18 = arith.constant 0 : index
      %c0_19 = arith.constant 0 : index
      %23 = vector.load %arg9[%c0_18, %c0_19] : memref<16x128xf32, #tpu.memory_space<vmem>>, vector<16x128xf32>
      tpu.vector_store %arg9[%c0_18, %c0_19], %22 {strides = array<i32>} : memref<16x128xf32, #tpu.memory_space<vmem>>, vector<16x128xf32>,
    } else {
    }
    %c0 = arith.constant 0 : index
    %c0_1 = arith.constant 0 : index
    %3 = vector.load %arg3[%c0, %c0_1] : memref<16x128xbf16, #tpu.memory_space<vmem>>, vector<16x128xbf16>
    %c0_2 = arith.constant 0 : index
    %c0_3 = arith.constant 0 : index
    %4 = vector.load %arg4[%c0_2, %c0_3] : memref<128x256xbf16, #tpu.memory_space<vmem>>, vector<128x256xbf16>
    %cst = arith.constant dense<0.000000e+00> : vector<16x256xf32>
    %5 = tpu.matmul %3, %4, %cst {dimension_numbers = #tpu.dot_dimension_numbers<[1], [0], [0], [1], [0, 0, 1, 1], [], []>} : vector<16x128xbf16>, vector<128x256xbf16>, vector<16x256xf32> -> vector<16x256xf32>
    %c0_4 = arith.constant 0 : index
    %c0_5 = arith.constant 0 : index
    %6 = vector.load %arg5[%c0_4, %c0_5] : memref<1x256xf32, #tpu.memory_space<vmem>>, vector<1x256xf32>
    %7 = vector.broadcast %6 : vector<1x256xf32> to vector<16x256xf32>
    %8 = arith.addf %5, %7 : vector<16x256xf32>
    %cst_6 = arith.constant 0.000000e+00 : f32
    %9 = vector.broadcast %cst_6 : f32 to vector<16x256xf32>
    %10 = arith.maximumf %8, %9 : vector<16x256xf32>
    %c0_7 = arith.constant 0 : index
    %c0_8 = arith.constant 0 : index
    %11 = vector.load %arg9[%c0_7, %c0_8] : memref<16x128xf32, #tpu.memory_space<vmem>>, vector<16x128xf32>
    %12 = arith.truncf %10 : vector<16x256xf32> to vector<16x256xbf16>
    %c0_9 = arith.constant 0 : index
    %c0_10 = arith.constant 0 : index
    %13 = vector.load %arg6[%c0_9, %c0_10] : memref<256x128xbf16, #tpu.memory_space<vmem>>, vector<256x128xbf16>
    %cst_11 = arith.constant dense<0.000000e+00> : vector<16x128xf32>
    %14 = tpu.matmul %12, %13, %cst_11 {dimension_numbers = #tpu.dot_dimension_numbers<[1], [0], [0], [1], [0, 0, 1, 1], [], []>} : vector<16x256xbf16>, vector<256x128xbf16>, vector<16x128xf32> -> vector<16x128xf32>
    %15 = arith.addf %11, %14 : vector<16x128xf32>
    %c0_12 = arith.constant 0 : index
    %c0_13 = arith.constant 0 : index
    %16 = vector.load %arg9[%c0_12, %c0_13] : memref<16x128xf32, #tpu.memory_space<vmem>>, vector<16x128xf32>
    tpu.vector_store %arg9[%c0_12, %c0_13], %15 {strides = array<i32>} : memref<16x128xf32, #tpu.memory_space<vmem>>, vector<16x128xf32>,
    %c0_i32_14 = arith.constant 0 : i32
    %17 = arith.cmpi eq, %arg2, %c0_i32_14 : i32
    %18 = arith.extui %17 : i1 to i32
    %c0_i32_15 = arith.constant 0 : i32
    %19 = arith.cmpi ne, %18, %c0_i32_15 : i32
    scf.if %19 {
      %c0_16 = arith.constant 0 : index
      %c0_17 = arith.constant 0 : index
      %20 = vector.load %arg9[%c0_16, %c0_17] : memref<16x128xf32, #tpu.memory_space<vmem>>, vector<16x128xf32>
      %c0_18 = arith.constant 0 : index
      %c0_19 = arith.constant 0 : index
      %21 = vector.load %arg8[%c0_18, %c0_19] : memref<16x128xf32, #tpu.memory_space<vmem>>, vector<16x128xf32>
      tpu.vector_store %arg8[%c0_18, %c0_19], %20 {strides = array<i32>} : memref<16x128xf32, #tpu.memory_space<vmem>>, vector<16x128xf32>,
    } else {
    }
    return
  }
  func.func @transform_0(%arg0: i32, %arg1: i32, %arg2: i32) -> (i32, i32) {
    %c0_i32 = arith.constant 0 : i32
    %c0_i32_0 = arith.constant 0 : i32
    return %arg0, %c0_i32 : i32, i32
  }
  func.func @transform_1(%arg0: i32, %arg1: i32, %arg2: i32) -> (i32, i32) {
    %c0_i32 = arith.constant 0 : i32
    %c0_i32_0 = arith.constant 0 : i32
    return %c0_i32, %arg2 : i32, i32
  }
  func.func @transform_2(%arg0: i32, %arg1: i32, %arg2: i32) -> (i32, i32) {
    %c0_i32 = arith.constant 0 : i32
    %c0_i32_0 = arith.constant 0 : i32
    return %c0_i32, %arg2 : i32, i32
  }
  func.func @transform_3(%arg0: i32, %arg1: i32, %arg2: i32) -> (i32, i32) {
    %c0_i32 = arith.constant 0 : i32
    return %arg2, %arg1 : i32, i32
  }
  func.func @transform_4(%arg0: i32, %arg1: i32, %arg2: i32) -> (i32, i32) {
    %c0_i32 = arith.constant 0 : i32
    %c0_i32_0 = arith.constant 0 : i32
    return %c0_i32, %arg1 : i32, i32
  }
  func.func @transform_5(%arg0: i32, %arg1: i32, %arg2: i32) -> (i32, i32) {
    %c0_i32 = arith.constant 0 : i32
    return %arg0, %arg1 : i32, i32
  }
}

</mosaic_0001>

<bundles_post_ra>
// kernel: _ffn_call.1
= control target key start
LH: loop header
LB: loop body
LE: loop exit
PB: predicated region body
PF: predicated region fallthrough
CT: control target
= control target key end

     0   :  { %10 = vsyncpa [#allocation4], 0  ;;  %s740_s0 = inlined_call_operand.hbm [shape: bf16[16,128], index: 0, kind: input, shape index: {}]   ;;  %s741_s1 = inlined_call_operand.hbm [shape: bf16[128,256], index: 1, kind: input, shape index: {}]   ;;  %s742_s2 = inlined_call_operand.vmem [shape: f32[1,256], index: 2, kind: input, shape index: {}]   ;;  %s743_s3 = inlined_call_operand.hbm [shape: bf16[256,128], index: 3, kind: input, shape index: {}]   ;;  %s744_s4 = inlined_call_operand.vmem [shape: f32[1,128], index: 4, kind: input, shape index: {}]   ;;  %s745_s5 = inlined_call_operand.hbm [shape: f32[16,128], index: 5, kind: output, shape index: {}]  }
   0x1   :  { %11 = vsyncpa [#allocation7], 0 }
   0x2   :  { %12 = vsyncpa [#allocation5], 0  ;;  %s641_s18 = smov [#allocation6]   ;;  %s547_s22 = scalar_lea.hbm %s741_s1, 2048 }
   0x3   :  { %s30_s19 = sshll.u32 %s641_s18, 4  ;;  %p548_p0 = scmp.ne.s32.totalorder %s741_s1, %s547_s22  ;;  %s31_s19 = int_to_ptr.vmem [resolvable:$true] %s30_s19 }
   0x4   :  { %p551_p1 = scmp.lt.u32.totalorder %s547_s22, %s741_s1 }
   0x6   :  { %p553_p2 = pnand %p551_p1, %p548_p0 }
   0x8   :  { %556 = shalt.err (!%p553_p2)
}
   0x9   :  { %s557_s27 = scalar_lea.vmem %s31_s19, 2048  ;;  %p562_p4 = scmp.lt.s32.totalorder %s31_s19, %s31_s19 }
   0xa   :  { %p558_p3 = scmp.ne.s32.totalorder %s31_s19, %s557_s27  ;;  %p563_p5 = scmp.lt.s32.totalorder %s557_s27, %s557_s27 }
   0xc   :  { %p564_p6 = por %p563_p5, %p562_p4 }
   0xe   :  { %p565_p7 = pnand %p564_p6, %p558_p3 }
  0x10   :  { %568 = shalt.err (!%p565_p7)
}
  0x11   :  { %s642_s28 = smov 128   ;;  %s643_s29 = smov 8  }
  0x12   :  { %36 = dma.hbm_to_vmem [thread:$0]  %s741_s1, 2048, %s31_s19, [#allocation7], %s642_s28, %s642_s28, %s643_s29  }
  0x13   :  { %s644_s7 = smov [#allocation3]   ;;  %s569_s11 = scalar_lea.hbm %s740_s0, 128 }
  0x14   :  { %s18_s8 = sshll.u32 %s644_s7, 4  ;;  %p570_p8 = scmp.ne.s32.totalorder %s740_s0, %s569_s11  ;;  %s19_s8 = int_to_ptr.vmem [resolvable:$true] %s18_s8 }
  0x15   :  { %p573_p9 = scmp.lt.u32.totalorder %s569_s11, %s740_s0 }
  0x17   :  { %p575_p10 = pnand %p573_p9, %p570_p8 }
  0x19   :  { %578 = shalt.err (!%p575_p10)
}
  0x1a   :  { %s579_s16 = scalar_lea.vmem %s19_s8, 128  ;;  %p584_p12 = scmp.lt.s32.totalorder %s19_s8, %s19_s8 }
  0x1b   :  { %p580_p11 = scmp.ne.s32.totalorder %s19_s8, %s579_s16  ;;  %p585_p13 = scmp.lt.s32.totalorder %s579_s16, %s579_s16 }
  0x1d   :  { %p586_p0 = por %p585_p13, %p584_p12 }
  0x1f   :  { %p587_p1 = pnand %p586_p0, %p580_p11 }
  0x21   :  { %590 = shalt.err (!%p587_p1)
}
  0x22   :  { %s645_s1 = smov 64   ;;  %s646_s17 = smov 4  }
  0x23   :  { %24 = dma.hbm_to_vmem [thread:$0]  %s740_s0, 128, %s19_s8, [#allocation4], %s645_s1, %s645_s1, %s646_s17  }
  0x24   :  { %s647_s20 = smov [#allocation8]   ;;  %s591_s24 = scalar_lea.hbm %s743_s3, 2048 }
  0x25   :  { %s44_s21 = sshll.u32 %s647_s20, 4  ;;  %p592_p2 = scmp.ne.s32.totalorder %s743_s3, %s591_s24  ;;  %s45_s21 = int_to_ptr.vmem [resolvable:$true] %s44_s21 }
  0x26   :  { %p595_p3 = scmp.lt.u32.totalorder %s591_s24, %s743_s3 }
  0x28   :  { %p597_p4 = pnand %p595_p3, %p592_p2 }
  0x2a   :  { %600 = shalt.err (!%p597_p4)
}
  0x2b   :  { %s601_s6 = scalar_lea.vmem %s45_s21, 2048  ;;  %p606_p6 = scmp.lt.s32.totalorder %s45_s21, %s45_s21 }
  0x2c   :  { %p602_p5 = scmp.ne.s32.totalorder %s45_s21, %s601_s6  ;;  %p607_p7 = scmp.lt.s32.totalorder %s601_s6, %s601_s6 }
  0x2e   :  { %p608_p8 = por %p607_p7, %p606_p6 }
  0x30   :  { %p609_p9 = pnand %p608_p8, %p602_p5 }
  0x32   :  { %612 = shalt.err (!%p609_p9)
}
  0x33   :  { %50 = dma.hbm_to_vmem [thread:$0]  %s743_s3, 2048, %s45_s21, [#allocation7], %s645_s1, %s645_s1, %s646_s17  }
  0x34   :  { %635 = dma.done.wait [#allocation4], 128  }
  0x35   :  { %636 = vsyncadd [#allocation4], 4294967168 }
  0x36   :  { %637 = dma.done.wait [#allocation7], 4096  }
  0x37   :  { %638 = vsyncadd [#allocation7], 4294963200  ;;  %v648_v0 = vmov 0   ;;  %v506_v1 = vld [vmem:[#allocation6 + $0x4] ss:$8 sps:$4 sm:$0xff]   ;;  %v535_v16 = vld [vmem:[#allocation8 + $0x50] sm:$0xff]   ;;  %v96_v34 = vlaneseq }
  0x38   :  { %224 = vmatprep.mubr.bf16.mxu0 %v648_v0  ;;  %v508_v2 = vld [vmem:[#allocation6] ss:$8 sps:$4 sm:$0xff]   ;;  %192 = vmatprep.subr.bf16.mxu0 %v506_v1  ;;  %v509_v3 = vld [vmem:[#allocation6 + $0x14] ss:$8 sps:$4 sm:$0xff]   ;;  %v511_v4 = vld [vmem:[#allocation6 + $0x10] ss:$8 sps:$4 sm:$0xff]  }
  0x39   :  { %193 = vmatpush1.bf16.msra.mxu0 %v508_v2  ;;  %v512_v5 = vld [vmem:[#allocation6 + $0x24] ss:$8 sps:$4 sm:$0xff]   ;;  %v514_v6 = vld [vmem:[#allocation6 + $0x20] ss:$8 sps:$4 sm:$0xff]   ;;  %v515_v7 = vld [vmem:[#allocation6 + $0x34] ss:$8 sps:$4 sm:$0xff]  }
  0x3a   :  { %194 = vmatprep.subr.bf16.mxu0 %v509_v3  ;;  %v517_v8 = vld [vmem:[#allocation6 + $0x30] ss:$8 sps:$4 sm:$0xff]   ;;  %v518_v9 = vld [vmem:[#allocation6 + $0x44] ss:$8 sps:$4 sm:$0xff]   ;;  %v520_v11 = vld [vmem:[#allocation6 + $0x40] ss:$8 sps:$4 sm:$0xff]  }
  0x3b   :  { %v531_v10 = vld [vmem:[#allocation8 + $0x40] sm:$0xff]   ;;  %v521_v13 = vld [vmem:[#allocation6 + $0x54] ss:$8 sps:$4 sm:$0xff]   ;;  %v533_v14 = vld [vmem:[#allocation8 + $0x48] sm:$0xff]   ;;  %v97_v35 = vshrl.u32 %v96_v34, 7  ;;  %s649_s10 = smov [#allocation9]  }
  0x3c   :  { %v532_v12 = vld [vmem:[#allocation8] sm:$0xff]   ;;  %475 = vmatprep.subr.bf16.mxu1 %v531_v10  ;;  %v534_v15 = vld [vmem:[#allocation8 + $0x8] sm:$0xff]   ;;  %v523_v17 = vld [vmem:[#allocation6 + $0x50] ss:$8 sps:$4 sm:$0xff]   ;;  %s428_s11 = sshll.u32 %s649_s10, 4  ;;  %s429_s11 = int_to_ptr.vmem [resolvable:$true] %s428_s11 }
  0x3d   :  { %195 = vmatpush1.bf16.msra.mxu0 %v511_v4  ;;  %476 = vmatpush3.bf16.msra.mxu1 %v532_v12  ;;  %v524_v18 = vld [vmem:[#allocation6 + $0x64] ss:$8 sps:$4 sm:$0xff]   ;;  %v536_v19 = vld [vmem:[#allocation8 + $0x10] sm:$0xff]   ;;  %v537_v20 = vld [vmem:[#allocation8 + $0x58] sm:$0xff]   ;;  %v98_v36 = vsub.s32 0, %v97_v35  ;;  %v102_v38 = vsub.s32 1, %v97_v35  ;;  %p618_p11 = scmp.lt.s32.totalorder %s429_s11, %s429_s11 }
  0x3e   :  { %196 = vmatprep.subr.bf16.mxu0 %v512_v5  ;;  %477 = vmatprep.subr.bf16.mxu1 %v533_v14  ;;  %v526_v21 = vld [vmem:[#allocation6 + $0x60] ss:$8 sps:$4 sm:$0xff]   ;;  %v527_v22 = vld [vmem:[#allocation6 + $0x74] ss:$8 sps:$4 sm:$0xff]   ;;  %v529_v25 = vld [vmem:[#allocation6 + $0x70] ss:$8 sps:$4 sm:$0xff]  }
  0x3f   :  { %v538_v23 = vld [vmem:[#allocation8 + $0x18] sm:$0xff]   ;;  %v539_v24 = vld [vmem:[#allocation8 + $0x60] sm:$0xff]   ;;  %v541_v27 = vld [vmem:[#allocation8 + $0x68] sm:$0xff]   ;;  %s613_s12 = scalar_lea.vmem %s429_s11, 256 }
  0x40   :  { %v540_v26 = vld [vmem:[#allocation8 + $0x20] sm:$0xff]   ;;  %v530_v28 = vld [vmem:[#allocation3] sm:$0xff]   ;;  %v542_v29 = vld [vmem:[#allocation8 + $0x28] sm:$0xff]   ;;  %p614_p10 = scmp.ne.s32.totalorder %s429_s11, %s613_s12  ;;  %p619_p12 = scmp.lt.s32.totalorder %s613_s12, %s613_s12 }
  0x41   :  { %197 = vmatpush1.bf16.msra.mxu0 %v514_v6  ;;  %478 = vmatpush3.bf16.msra.mxu1 %v534_v15  ;;  %v543_v30 = vld [vmem:[#allocation8 + $0x70] sm:$0xff]   ;;  %v545_v32 = vld [vmem:[#allocation8 + $0x78] sm:$0xff]  }
  0x42   :  { %198 = vmatprep.subr.bf16.mxu0 %v515_v7  ;;  %479 = vmatprep.subr.bf16.mxu1 %v535_v16  ;;  %v544_v31 = vld [vmem:[#allocation8 + $0x30] sm:$0xff]   ;;  %v546_v33 = vld [vmem:[#allocation8 + $0x38] sm:$0xff]   ;;  %p620_p13 = por %p619_p12, %p618_p11 }
  0x43   :  { %v94_v37 = vld [vmem:[%s742_s2] sm:$0x3] }
  0x44   :  { %v99_v39 = vrot.slane %v94_v37, %v98_v36  ;;  %v103_v40 = vrot.slane %v94_v37, %v102_v38  ;;  %v441_v56 = vld [vmem:[%s744_s4] ss:$0 sm:$0xff]  ;;  %p621_p0 = pnand %p620_p13, %p614_p10 }
  0x45   :  { %199 = vmatpush1.bf16.msra.mxu0 %v517_v8  ;;  %480 = vmatpush3.bf16.msra.mxu1 %v536_v19 }
  0x46   :  { %200 = vmatprep.subr.bf16.mxu0 %v518_v9  ;;  %481 = vmatprep.subr.bf16.mxu1 %v537_v20 }
  0x49   :  { %201 = vmatpush1.bf16.msra.mxu0 %v520_v11  ;;  %482 = vmatpush3.bf16.msra.mxu1 %v538_v23 }
  0x4a   :  { %202 = vmatprep.subr.bf16.mxu0 %v521_v13  ;;  %483 = vmatprep.subr.bf16.mxu1 %v539_v24 }
  0x4d   :  { %203 = vmatpush1.bf16.msra.mxu0 %v523_v17  ;;  %484 = vmatpush3.bf16.msra.mxu1 %v540_v26 }
  0x4e   :  { %204 = vmatprep.subr.bf16.mxu0 %v524_v18  ;;  %485 = vmatprep.subr.bf16.mxu1 %v541_v27 }
  0x51   :  { %205 = vmatpush1.bf16.msra.mxu0 %v526_v21  ;;  %486 = vmatpush3.bf16.msra.mxu1 %v542_v29 }
  0x52   :  { %206 = vmatprep.subr.bf16.mxu0 %v527_v22  ;;  %487 = vmatprep.subr.bf16.mxu1 %v543_v30 }
  0x55   :  { %207 = vmatpush1.bf16.msra.mxu0 %v529_v25  ;;  %488 = vmatpush3.bf16.msra.mxu1 %v544_v31 }
  0x56   :  { %489 = vmatprep.subr.bf16.mxu1 %v545_v32 }
  0x58   :  { %225 = vmatmul.mubr.bf16.vlgmr.msra.gmra.mrb[0].mxu0 %v530_v28 }
  0x59   :  { %490 = vmatpush3.bf16.msra.mxu1 %v546_v33 }
 0x12b   :  { %v226_v41 = vpop.f32.mrb[0].mxu0 }
 0x12c   :  { %v227_v42 = vadd.f32 %v226_v41, %v99_v39  ;;  %v228_v43 = vpop.f32.mrb[1].mxu0 }
 0x12d   :  { %v229_v44 = vadd.f32 %v228_v43, %v103_v40  ;;  %v230_v45 = vpop.f32.mrb[2].mxu0 }
 0x12e   :  { %v231_v46 = vadd.f32 %v230_v45, %v99_v39  ;;  %v232_v47 = vpop.f32.mrb[3].mxu0  ;;  %v235_v49 = vmax.f32 %v227_v42, 0.0 }
 0x12f   :  { %v233_v48 = vadd.f32 %v232_v47, %v103_v40  ;;  %v236_v51 = vmax.f32 %v229_v44, 0.0 }
 0x130   :  { %v237_v50 = vmax.f32 %v231_v46, 0.0 }
 0x131   :  { %v238_v52 = vmax.f32 %v233_v48, 0.0 }
 0x132   :  { %v241_v53 = vpack.c.bf16 %v237_v50, %v235_v49 }
 0x133   :  { %v242_v54 = vpack.c.bf16 %v238_v52, %v236_v51 }
 0x135   :  { %403 = vmatprep.mubr.bf16.mxu1 %v242_v54 }
 0x136   :  { %404 = vmatmul.mubr.bf16.vlgmr.msra.gmra.mrb[0].mxu1 %v241_v53 }
 0x209   :  { %v491_v55 = vpop.f32.mrb[0].mxu1 }
 0x20a   :  { %v492_v57 = vpop.f32.mrb[1].mxu1 }
 0x20b   :  { %v493_v58 = vadd.f32 %v492_v57, %v491_v55  ;;  %v494_v59 = vpop.f32.mrb[2].mxu1 }
 0x20c   :  { %v495_v60 = vpop.f32.mrb[3].mxu1 }
 0x20d   :  { %v412_v61 = vadd.f32 %v493_v58, %v441_v56  ;;  %v496_v62 = vadd.f32 %v495_v60, %v494_v59 }
 0x20f   :  { %421 = vst [vmem:[#allocation9] sm:$0xff] %v412_v61  ;;  %v413_v63 = vadd.f32 %v496_v62, %v441_v56 }
 0x211   :  { %422 = vst [vmem:[#allocation9 + $0x8] sm:$0xff] %v413_v63 }
 0x212   :  { %624 = shalt.err (!%p621_p0)
}
 0x213   :  { %s625_s14 = scalar_lea.hbm %s745_s5, 256 }
 0x214   :  { %p626_p1 = scmp.ne.s32.totalorder %s745_s5, %s625_s14  ;;  %p629_p2 = scmp.lt.u32.totalorder %s625_s14, %s745_s5 }
 0x216   :  { %p631_p3 = pnand %p629_p2, %p626_p1 }
 0x218   :  { %634 = shalt.err (!%p631_p3)
}
 0x219   :  { %434 = dma.vmem_to_hbm [thread:$0]  %s429_s11, 256, %s745_s5, [#allocation5], %s642_s28, %s642_s28, %s643_s29  }
 0x21a   :  { %639 = dma.done.wait [#allocation5], 256  }
 0x21b   :  { %640 = vsyncadd [#allocation5], 4294967040 }
 0x21c   :  { %438 = vsyncpa [#allocation4], 1 }
 0x21d   :  { %439 = vsyncpa [#allocation7], 1 }
 0x21e   :  { %440 = vsyncpa [#allocation5], 1 }

</bundles_post_ra>
